<compile_context>
chip_gen: v6e
topology: v6e:2x2x1
jax: 0.10.0
libtpu: 0.0.40
codegen_flags: <defaults>
</compile_context>

<pallas_src>
import functools

import jax
import jax.numpy as jnp
from jax.experimental import pallas as pl
from jax.experimental.pallas import tpu as pltpu

LANES = 128
SUBLANES = 8


def _fold_to_sublane_tile(x):
    """Reduce a (rows, 128) block to an (8, 128) partial sum.

    For rows % 8 == 0 this is pure vreg+vreg adds (no cross-sublane shuffle in
    the hot loop).  The fallback (tiny full-extent blocks only) does one
    sublane reduction and places it in row 0.
    """
    rows = x.shape[0]
    if rows % SUBLANES == 0 and rows >= SUBLANES:
        return jnp.sum(x.reshape(rows // SUBLANES, SUBLANES, LANES), axis=0)
    s = jnp.sum(x, axis=0, keepdims=True)                      # (1, 128)
    row_id = jax.lax.broadcasted_iota(jnp.int32, (SUBLANES, LANES), 0)
    return jnp.where(row_id == 0, jnp.broadcast_to(s, (SUBLANES, LANES)), 0.0)


def _dice_focal_sums_kernel(p_ref, t_ref, out_ref, *, block_r, steps,
                            total_rows, needs_mask):
    # p_ref:   (2, block_r, 128) logits (both channel planes of one batch item)
    # t_ref:   (block_r, 128) integer class labels in {0, 1}
    # out_ref: (4, 8, 128) resident per-(batch, row-half) accumulator
    #   slot 0: sum softmax(preds)[:, 1]
    #   slot 1: sum (targets == 1)
    #   slot 2: sum p1 * (targets == 1)     (dice intersection)
    #   slot 3: sum per-pixel cross entropy
    @pl.when(pl.program_id(2) == 0)
    def _():
        out_ref[...] = jnp.zeros_like(out_ref)

    l0 = p_ref[0].astype(jnp.float32)      # (block_r, 128)
    l1 = p_ref[1].astype(jnp.float32)
    t = t_ref[...]

    # Two-class softmax / cross-entropy via the logit difference:
    # one exp, one log, one approx reciprocal per pixel; stable for any |d|.
    d = l1 - l0
    e = jnp.exp(-jnp.abs(d))                            # exp(-|d|)    (EUP)
    one_plus_e = 1.0 + e                                 # CSE'd for rcp + log
    inv = pl.reciprocal(one_plus_e, approx=True)         # EUP vrcp, no Newton VALU
    p1 = jnp.where(d >= 0, inv, e * inv)                 # sigmoid(d) == softmax[:, 1]
    softplus = jnp.maximum(d, 0.0) + jnp.log(one_plus_e)  # logsumexp(l0, l1) - l0
    tmask = (t == 1).astype(jnp.float32)
    ce = softplus - d * tmask                             # logsumexp - logit[target]

    if needs_mask:
        # Tail block: pixel rows >= total_rows come from Pallas block padding
        # (unspecified data) and must not contribute to the sums.
        blk = pl.program_id(1) * steps + pl.program_id(2)
        row_start = blk * block_r
        rid = jax.lax.broadcasted_iota(jnp.int32, (block_r, LANES), 0) + row_start
        valid = rid < total_rows
        p1 = jnp.where(valid, p1, 0.0)
        tmask = jnp.where(valid, tmask, 0.0)
        ce = jnp.where(valid, ce, 0.0)

    # Four separate (8,128) RMWs: keeps each producer chain fusable with its
    # fold and avoids materialising a stacked (4,8,128) temporary.
    out_ref[0, :, :] += _fold_to_sublane_tile(p1)
    out_ref[1, :, :] += _fold_to_sublane_tile(tmask)
    out_ref[2, :, :] += _fold_to_sublane_tile(p1 * tmask)
    out_ref[3, :, :] += _fold_to_sublane_tile(ce)


def _pick_block_rows(rows, max_rows):
    """Row-block size: full extent if it fits, else max_rows rounded to 8."""
    if rows <= max_rows:
        return rows                                  # full extent is always legal
    return max(SUBLANES, (max_rows // SUBLANES) * SUBLANES)


@functools.partial(jax.jit, static_argnames=("dice_weight", "focal_weight",
                                              "smooth", "gamma",
                                              "max_block_rows"))
def dice_focal_loss(preds, targets, *, dice_weight=0.5, focal_weight=0.5,
                    smooth=1e-6, gamma=2.0, max_block_rows=2048):
    N, C, H, W = preds.shape
    assert C == 2, "DiceLoss takes softmax channel 1; kernel assumes 2 classes"
    HW = H * W
    # TODO(synk): pad the pixel axis when H*W is not a multiple of 128.
    assert HW % LANES == 0, "H*W must be a multiple of 128"
    rows = HW // LANES

    block_r = _pick_block_rows(rows, max_block_rows)
    row_blocks = -(-rows // block_r)                 # cdiv
    needs_mask = (rows % block_r) != 0
    # 2-way "parallel" row split keeps both v7x TensorCores busy for small N.
    par = 2 if (row_blocks >= 2 and row_blocks % 2 == 0) else 1
    steps = row_blocks // par

    # Free reshapes only: no channel gather, no dtype conversion pass over HBM.
    p = preds.reshape(N, 2, rows, LANES)
    t = targets.reshape(N, rows, LANES)              # native integer dtype

    kernel = functools.partial(_dice_focal_sums_kernel, block_r=block_r,
                               steps=steps, total_rows=rows,
                               needs_mask=needs_mask)

    # Scoped-VMEM budget: double-buffered input blocks + elementwise temps +
    # accumulator, with headroom; keeps v5e's 16 MiB default from capping tiles
    # and stays under v7x's 64 MiB physical VMEM.
    itemsize_p = jnp.dtype(preds.dtype).itemsize
    itemsize_t = jnp.dtype(targets.dtype).itemsize
    block_bytes = block_r * LANES * (2 * itemsize_p + itemsize_t)
    vmem_limit = int(min(max(2 * block_bytes + 10 * block_r * LANES * 4
                             + (2 << 20), 32 << 20), 64 << 20))

    sums = pl.pallas_call(
        kernel,
        out_shape=jax.ShapeDtypeStruct((N, par, 4, SUBLANES, LANES),
                                       jnp.float32),
        grid=(N, par, steps),
        in_specs=[
            pl.BlockSpec((None, 2, block_r, LANES),
                         lambda n, h, i: (n, 0, h * steps + i, 0)),
            pl.BlockSpec((None, block_r, LANES),
                         lambda n, h, i: (n, h * steps + i, 0)),
        ],
        out_specs=pl.BlockSpec((None, None, 4, SUBLANES, LANES),
                               lambda n, h, i: (n, h, 0, 0, 0)),
        compiler_params=pltpu.CompilerParams(
            dimension_semantics=("parallel", "parallel", "arbitrary"),
            vmem_limit_bytes=vmem_limit),
    )(p, t)

    totals = jnp.sum(sums, axis=(0, 1, 3, 4))                   # (4,)
    sum_p1, sum_t = totals[0], totals[1]
    sum_inter, sum_ce = totals[2], totals[3]
    npix = N * HW

    # DiceLoss
    dice = (2.0 * sum_inter + smooth) / (sum_p1 + sum_t + smooth)
    dice_loss = 1.0 - dice

    # FocalLoss (CE with mean reduction over all N*H*W pixels, matching
    # nn.CrossEntropyLoss default; (1-pt)^gamma applied to the mean CE as in
    # the reference module)
    ce_loss = sum_ce / npix
    pt = jnp.exp(-ce_loss)
    focal = (1.0 - pt) ** gamma * ce_loss

    return dice_weight * dice_loss + focal_weight * focal


def _reference_loss(preds, targets, dice_weight=0.5, focal_weight=0.5,
                    smooth=1e-6, gamma=2.0):
    # Pure-JAX reference mirroring the PyTorch module.
    probs = jax.nn.softmax(preds, axis=1)[:, 1, :, :]
    tmask = (targets == 1).astype(jnp.float32)
    inter = jnp.sum(probs * tmask)
    dice = (2.0 * inter + smooth) / (jnp.sum(probs) + jnp.sum(tmask) + smooth)
    dice_loss = 1.0 - dice

    logp = jax.nn.log_softmax(preds, axis=1)
    nll = -jnp.take_along_axis(logp, targets[:, None, :, :], axis=1)[:, 0]
    ce_loss = jnp.mean(nll)
    pt = jnp.exp(-ce_loss)
    focal = (1.0 - pt) ** gamma * ce_loss
    return dice_weight * dice_loss + focal_weight * focal


def _check(preds, targets, **kw):
    loss = jax.block_until_ready(dice_focal_loss(preds, targets, **kw))
    ref = _reference_loss(preds, targets)
    # approx reciprocal (EUP vrcp) shifts the result by ~1e-4 relative.
    assert jnp.allclose(loss, ref, rtol=3e-3, atol=1e-3), (loss, ref)


if __name__ == "__main__":
    key = jax.random.PRNGKey(0)

    # 1) Small NCHW shape consistent with the module; full-extent block,
    #    fallback (non-multiple-of-8) fold path.
    kp, kt = jax.random.split(key)
    preds = jax.random.normal(kp, (2, 2, 16, 16), dtype=jnp.float32)
    targets = jax.random.randint(kt, (2, 16, 16), 0, 2, dtype=jnp.int32)
    _check(preds, targets)

    # 2) Multi-step accumulation + 2-way parallel row split (par=2, steps=2),
    #    aligned fold path.
    kp2, kt2 = jax.random.split(jax.random.PRNGKey(1))
    preds2 = jax.random.normal(kp2, (1, 2, 128, 128), dtype=jnp.float32)
    targets2 = jax.random.randint(kt2, (1, 128, 128), 0, 2, dtype=jnp.int32)
    _check(preds2, targets2, max_block_rows=32)

    # 3) Padded tail block with in-kernel masking + par=2 (rows=12, block_r=8).
    kp3, kt3 = jax.random.split(jax.random.PRNGKey(2))
    preds3 = jax.random.normal(kp3, (1, 2, 24, 64), dtype=jnp.float32)
    targets3 = jax.random.randint(kt3, (1, 24, 64), 0, 2, dtype=jnp.int32)
    _check(preds3, targets3, max_block_rows=8)

    # 4) Padded tail block with odd block count -> par=1 path (rows=20, block_r=8).
    kp4, kt4 = jax.random.split(jax.random.PRNGKey(3))
    preds4 = jax.random.normal(kp4, (1, 2, 40, 64), dtype=jnp.float32)
    targets4 = jax.random.randint(kt4, (1, 40, 64), 0, 2, dtype=jnp.int32)
    _check(preds4, targets4, max_block_rows=8)

    print("KERNEL_OK")
</pallas_src>

<mosaic_0001>
module attributes {stable_mosaic.version = 11 : i64} {
  func.func @_dice_focal_sums_kernel(%arg0: i32, %arg1: i32, %arg2: i32, %arg3: memref<1x2x2x128xf32, #tpu.memory_space<vmem>>, %arg4: memref<1x2x128xi32, #tpu.memory_space<vmem>>, %arg5: memref<1x1x4x8x128xf32, #tpu.memory_space<vmem>>) attributes {dimension_semantics = [#tpu.dimension_semantics<parallel>, #tpu.dimension_semantics<parallel>, #tpu.dimension_semantics<arbitrary>], iteration_bounds = array<i64: 2, 1, 1>, scalar_prefetch = 0 : i64, scratch_operands = 0 : i64, tpu.core_type = #tpu.core_type<tc>, window_params = [{transform_indices = @transform_0, window_bounds = array<i64: 1, 2, 2, 128>}, {transform_indices = @transform_1, window_bounds = array<i64: 1, 2, 128>}, {transform_indices = @transform_2, window_bounds = array<i64: 1, 1, 4, 8, 128>}]} {
    %c0_i32 = arith.constant 0 : i32
    %0 = arith.cmpi eq, %arg2, %c0_i32 : i32
    %1 = arith.extui %0 : i1 to i32
    %c0_i32_0 = arith.constant 0 : i32
    %2 = arith.cmpi ne, %1, %c0_i32_0 : i32
    scf.if %2 {
      %cst_63 = arith.constant 0.000000e+00 : f32
      %92 = vector.broadcast %cst_63 : f32 to vector<4x8x128xf32>
      %c0_64 = arith.constant 0 : index
      %c0_65 = arith.constant 0 : index
      %c0_66 = arith.constant 0 : index
      %c0_67 = arith.constant 0 : index
      %c0_68 = arith.constant 0 : index
      %93 = vector.load %arg5[%c0_64, %c0_65, %c0_66, %c0_67, %c0_68] : memref<1x1x4x8x128xf32, #tpu.memory_space<vmem>>, vector<1x1x4x8x128xf32>
      %94 = vector.shape_cast %93 : vector<1x1x4x8x128xf32> to vector<4x8x128xf32>
      %95 = vector.shape_cast %92 : vector<4x8x128xf32> to vector<1x1x4x8x128xf32>
      tpu.vector_store %arg5[%c0_64, %c0_65, %c0_66, %c0_67, %c0_68], %95 {strides = array<i32>} : memref<1x1x4x8x128xf32, #tpu.memory_space<vmem>>, vector<1x1x4x8x128xf32>,
    } else {
    }
    %c0 = arith.constant 0 : index
    %c0_1 = arith.constant 0 : index
    %c0_2 = arith.constant 0 : index
    %c0_3 = arith.constant 0 : index
    %3 = vector.load %arg3[%c0, %c0_1, %c0_2, %c0_3] : memref<1x2x2x128xf32, #tpu.memory_space<vmem>>, vector<1x1x2x128xf32>
    %4 = vector.shape_cast %3 : vector<1x1x2x128xf32> to vector<2x128xf32>
    %c0_4 = arith.constant 0 : index
    %c1 = arith.constant 1 : index
    %c0_5 = arith.constant 0 : index
    %c0_6 = arith.constant 0 : index
    %5 = vector.load %arg3[%c0_4, %c1, %c0_5, %c0_6] : memref<1x2x2x128xf32, #tpu.memory_space<vmem>>, vector<1x1x2x128xf32>
    %6 = vector.shape_cast %5 : vector<1x1x2x128xf32> to vector<2x128xf32>
    %c0_7 = arith.constant 0 : index
    %c0_8 = arith.constant 0 : index
    %c0_9 = arith.constant 0 : index
    %7 = vector.load %arg4[%c0_7, %c0_8, %c0_9] : memref<1x2x128xi32, #tpu.memory_space<vmem>>, vector<1x2x128xi32>
    %8 = vector.shape_cast %7 : vector<1x2x128xi32> to vector<2x128xi32>
    %9 = arith.subf %6, %4 : vector<2x128xf32>
    %10 = math.absf %9 : vector<2x128xf32>
    %cst = arith.constant 0.000000e+00 : f32
    %11 = vector.broadcast %cst : f32 to vector<2x128xf32>
    %12 = arith.subf %11, %10 : vector<2x128xf32>
    %13 = math.exp %12 : vector<2x128xf32>
    %cst_10 = arith.constant 1.000000e+00 : f32
    %14 = vector.broadcast %cst_10 : f32 to vector<2x128xf32>
    %15 = arith.addf %14, %13 : vector<2x128xf32>
    %16 = tpu.reciprocal %15 {approx = true} : vector<2x128xf32> -> vector<2x128xf32>
    %cst_11 = arith.constant 0.000000e+00 : f32
    %17 = vector.broadcast %cst_11 : f32 to vector<2x128xf32>
    %18 = arith.cmpf oge, %9, %17 : vector<2x128xf32>
    %19 = arith.mulf %13, %16 : vector<2x128xf32>
    %20 = arith.select %18, %16, %19 : vector<2x128xi1>, vector<2x128xf32>
    %cst_12 = arith.constant 0.000000e+00 : f32
    %21 = vector.broadcast %cst_12 : f32 to vector<2x128xf32>
    %22 = arith.maximumf %9, %21 : vector<2x128xf32>
    %23 = math.log %15 : vector<2x128xf32>
    %24 = arith.addf %22, %23 : vector<2x128xf32>
    %c1_i32 = arith.constant 1 : i32
    %25 = vector.broadcast %c1_i32 : i32 to vector<2x128xi32>
    %26 = arith.cmpi eq, %8, %25 : vector<2x128xi32>
    %27 = arith.extui %26 : vector<2x128xi1> to vector<2x128xi32>
    %28 = arith.sitofp %27 : vector<2x128xi32> to vector<2x128xf32>
    %29 = arith.mulf %9, %28 : vector<2x128xf32>
    %30 = arith.subf %24, %29 : vector<2x128xf32>
    %c0_13 = arith.constant 0 : index
    %c0_14 = arith.constant 0 : index
    %c0_15 = arith.constant 0 : index
    %c0_16 = arith.constant 0 : index
    %c0_17 = arith.constant 0 : index
    %31 = vector.load %arg5[%c0_13, %c0_14, %c0_15, %c0_16, %c0_17] : memref<1x1x4x8x128xf32, #tpu.memory_space<vmem>>, vector<1x1x1x8x128xf32>
    %32 = vector.shape_cast %31 : vector<1x1x1x8x128xf32> to vector<8x128xf32>
    %cst_18 = arith.constant dense<0.000000e+00> : vector<128xf32>
    %33 = vector.multi_reduction <add>, %20, %cst_18 [0] : vector<2x128xf32> to vector<128xf32>
    %34 = vector.shape_cast %33 : vector<128xf32> to vector<1x128xf32>
    %35 = tpu.iota {dimensions = array<i32: 0>} : vector<8x128xi32>
    %c0_i32_19 = arith.constant 0 : i32
    %36 = vector.broadcast %c0_i32_19 : i32 to vector<8x128xi32>
    %37 = arith.cmpi eq, %35, %36 : vector<8x128xi32>
    %38 = vector.shape_cast %34 : vector<1x128xf32> to vector<1x128xf32>
    %39 = vector.broadcast %38 : vector<1x128xf32> to vector<8x128xf32>
    %cst_20 = arith.constant 0.000000e+00 : f32
    %40 = vector.broadcast %cst_20 : f32 to vector<8x128xf32>
    %41 = arith.select %37, %39, %40 : vector<8x128xi1>, vector<8x128xf32>
    %42 = arith.addf %32, %41 : vector<8x128xf32>
    %c0_21 = arith.constant 0 : index
    %c0_22 = arith.constant 0 : index
    %c0_23 = arith.constant 0 : index
    %c0_24 = arith.constant 0 : index
    %c0_25 = arith.constant 0 : index
    %43 = vector.load %arg5[%c0_21, %c0_22, %c0_23, %c0_24, %c0_25] : memref<1x1x4x8x128xf32, #tpu.memory_space<vmem>>, vector<1x1x1x8x128xf32>
    %44 = vector.shape_cast %43 : vector<1x1x1x8x128xf32> to vector<8x128xf32>
    %45 = vector.shape_cast %42 : vector<8x128xf32> to vector<1x1x1x8x128xf32>
    tpu.vector_store %arg5[%c0_21, %c0_22, %c0_23, %c0_24, %c0_25], %45 {strides = array<i32>} : memref<1x1x4x8x128xf32, #tpu.memory_space<vmem>>, vector<1x1x1x8x128xf32>,
    %c0_26 = arith.constant 0 : index
    %c0_27 = arith.constant 0 : index
    %c1_28 = arith.constant 1 : index
    %c0_29 = arith.constant 0 : index
    %c0_30 = arith.constant 0 : index
    %46 = vector.load %arg5[%c0_26, %c0_27, %c1_28, %c0_29, %c0_30] : memref<1x1x4x8x128xf32, #tpu.memory_space<vmem>>, vector<1x1x1x8x128xf32>
    %47 = vector.shape_cast %46 : vector<1x1x1x8x128xf32> to vector<8x128xf32>
    %cst_31 = arith.constant dense<0.000000e+00> : vector<128xf32>
    %48 = vector.multi_reduction <add>, %28, %cst_31 [0] : vector<2x128xf32> to vector<128xf32>
    %49 = vector.shape_cast %48 : vector<128xf32> to vector<1x128xf32>
    %50 = tpu.iota {dimensions = array<i32: 0>} : vector<8x128xi32>
    %c0_i32_32 = arith.constant 0 : i32
    %51 = vector.broadcast %c0_i32_32 : i32 to vector<8x128xi32>
    %52 = arith.cmpi eq, %50, %51 : vector<8x128xi32>
    %53 = vector.shape_cast %49 : vector<1x128xf32> to vector<1x128xf32>
    %54 = vector.broadcast %53 : vector<1x128xf32> to vector<8x128xf32>
    %cst_33 = arith.constant 0.000000e+00 : f32
    %55 = vector.broadcast %cst_33 : f32 to vector<8x128xf32>
    %56 = arith.select %52, %54, %55 : vector<8x128xi1>, vector<8x128xf32>
    %57 = arith.addf %47, %56 : vector<8x128xf32>
    %c0_34 = arith.constant 0 : index
    %c0_35 = arith.constant 0 : index
    %c1_36 = arith.constant 1 : index
    %c0_37 = arith.constant 0 : index
    %c0_38 = arith.constant 0 : index
    %58 = vector.load %arg5[%c0_34, %c0_35, %c1_36, %c0_37, %c0_38] : memref<1x1x4x8x128xf32, #tpu.memory_space<vmem>>, vector<1x1x1x8x128xf32>
    %59 = vector.shape_cast %58 : vector<1x1x1x8x128xf32> to vector<8x128xf32>
    %60 = vector.shape_cast %57 : vector<8x128xf32> to vector<1x1x1x8x128xf32>
    tpu.vector_store %arg5[%c0_34, %c0_35, %c1_36, %c0_37, %c0_38], %60 {strides = array<i32>} : memref<1x1x4x8x128xf32, #tpu.memory_space<vmem>>, vector<1x1x1x8x128xf32>,
    %c0_39 = arith.constant 0 : index
    %c0_40 = arith.constant 0 : index
    %c2 = arith.constant 2 : index
    %c0_41 = arith.constant 0 : index
    %c0_42 = arith.constant 0 : index
    %61 = vector.load %arg5[%c0_39, %c0_40, %c2, %c0_41, %c0_42] : memref<1x1x4x8x128xf32, #tpu.memory_space<vmem>>, vector<1x1x1x8x128xf32>
    %62 = vector.shape_cast %61 : vector<1x1x1x8x128xf32> to vector<8x128xf32>
    %63 = arith.mulf %20, %28 : vector<2x128xf32>
    %cst_43 = arith.constant dense<0.000000e+00> : vector<128xf32>
    %64 = vector.multi_reduction <add>, %63, %cst_43 [0] : vector<2x128xf32> to vector<128xf32>
    %65 = vector.shape_cast %64 : vector<128xf32> to vector<1x128xf32>
    %66 = tpu.iota {dimensions = array<i32: 0>} : vector<8x128xi32>
    %c0_i32_44 = arith.constant 0 : i32
    %67 = vector.broadcast %c0_i32_44 : i32 to vector<8x128xi32>
    %68 = arith.cmpi eq, %66, %67 : vector<8x128xi32>
    %69 = vector.shape_cast %65 : vector<1x128xf32> to vector<1x128xf32>
    %70 = vector.broadcast %69 : vector<1x128xf32> to vector<8x128xf32>
    %cst_45 = arith.constant 0.000000e+00 : f32
    %71 = vector.broadcast %cst_45 : f32 to vector<8x128xf32>
    %72 = arith.select %68, %70, %71 : vector<8x128xi1>, vector<8x128xf32>
    %73 = arith.addf %62, %72 : vector<8x128xf32>
    %c0_46 = arith.constant 0 : index
    %c0_47 = arith.constant 0 : index
    %c2_48 = arith.constant 2 : index
    %c0_49 = arith.constant 0 : index
    %c0_50 = arith.constant 0 : index
    %74 = vector.load %arg5[%c0_46, %c0_47, %c2_48, %c0_49, %c0_50] : memref<1x1x4x8x128xf32, #tpu.memory_space<vmem>>, vector<1x1x1x8x128xf32>
    %75 = vector.shape_cast %74 : vector<1x1x1x8x128xf32> to vector<8x128xf32>
    %76 = vector.shape_cast %73 : vector<8x128xf32> to vector<1x1x1x8x128xf32>
    tpu.vector_store %arg5[%c0_46, %c0_47, %c2_48, %c0_49, %c0_50], %76 {strides = array<i32>} : memref<1x1x4x8x128xf32, #tpu.memory_space<vmem>>, vector<1x1x1x8x128xf32>,
    %c0_51 = arith.constant 0 : index
    %c0_52 = arith.constant 0 : index
    %c3 = arith.constant 3 : index
    %c0_53 = arith.constant 0 : index
    %c0_54 = arith.constant 0 : index
    %77 = vector.load %arg5[%c0_51, %c0_52, %c3, %c0_53, %c0_54] : memref<1x1x4x8x128xf32, #tpu.memory_space<vmem>>, vector<1x1x1x8x128xf32>
    %78 = vector.shape_cast %77 : vector<1x1x1x8x128xf32> to vector<8x128xf32>
    %cst_55 = arith.constant dense<0.000000e+00> : vector<128xf32>
    %79 = vector.multi_reduction <add>, %30, %cst_55 [0] : vector<2x128xf32> to vector<128xf32>
    %80 = vector.shape_cast %79 : vector<128xf32> to vector<1x128xf32>
    %81 = tpu.iota {dimensions = array<i32: 0>} : vector<8x128xi32>
    %c0_i32_56 = arith.constant 0 : i32
    %82 = vector.broadcast %c0_i32_56 : i32 to vector<8x128xi32>
    %83 = arith.cmpi eq, %81, %82 : vector<8x128xi32>
    %84 = vector.shape_cast %80 : vector<1x128xf32> to vector<1x128xf32>
    %85 = vector.broadcast %84 : vector<1x128xf32> to vector<8x128xf32>
    %cst_57 = arith.constant 0.000000e+00 : f32
    %86 = vector.broadcast %cst_57 : f32 to vector<8x128xf32>
    %87 = arith.select %83, %85, %86 : vector<8x128xi1>, vector<8x128xf32>
    %88 = arith.addf %78, %87 : vector<8x128xf32>
    %c0_58 = arith.constant 0 : index
    %c0_59 = arith.constant 0 : index
    %c3_60 = arith.constant 3 : index
    %c0_61 = arith.constant 0 : index
    %c0_62 = arith.constant 0 : index
    %89 = vector.load %arg5[%c0_58, %c0_59, %c3_60, %c0_61, %c0_62] : memref<1x1x4x8x128xf32, #tpu.memory_space<vmem>>, vector<1x1x1x8x128xf32>
    %90 = vector.shape_cast %89 : vector<1x1x1x8x128xf32> to vector<8x128xf32>
    %91 = vector.shape_cast %88 : vector<8x128xf32> to vector<1x1x1x8x128xf32>
    tpu.vector_store %arg5[%c0_58, %c0_59, %c3_60, %c0_61, %c0_62], %91 {strides = array<i32>} : memref<1x1x4x8x128xf32, #tpu.memory_space<vmem>>, vector<1x1x1x8x128xf32>,
    return
  }
  func.func @transform_0(%arg0: i32, %arg1: i32, %arg2: i32) -> (i32, i32, i32, i32) {
    %c1_i32 = arith.constant 1 : i32
    %0 = arith.muli %arg1, %c1_i32 : i32
    %1 = arith.addi %0, %arg2 : i32
    %c0_i32 = arith.constant 0 : i32
    %c0_i32_0 = arith.constant 0 : i32
    %c0_i32_1 = arith.constant 0 : i32
    return %arg0, %c0_i32, %1, %c0_i32_0 : i32, i32, i32, i32
  }
  func.func @transform_1(%arg0: i32, %arg1: i32, %arg2: i32) -> (i32, i32, i32) {
    %c1_i32 = arith.constant 1 : i32
    %0 = arith.muli %arg1, %c1_i32 : i32
    %1 = arith.addi %0, %arg2 : i32
    %c0_i32 = arith.constant 0 : i32
    %c0_i32_0 = arith.constant 0 : i32
    return %arg0, %1, %c0_i32 : i32, i32, i32
  }
  func.func @transform_2(%arg0: i32, %arg1: i32, %arg2: i32) -> (i32, i32, i32, i32, i32) {
    %c0_i32 = arith.constant 0 : i32
    %c0_i32_0 = arith.constant 0 : i32
    %c0_i32_1 = arith.constant 0 : i32
    %c0_i32_2 = arith.constant 0 : i32
    return %arg0, %arg1, %c0_i32, %c0_i32_0, %c0_i32_1 : i32, i32, i32, i32, i32
  }
}

</mosaic_0001>

<bundles_post_ra>
// kernel: dice_focal_loss.1
= control target key start
LH: loop header
LB: loop body
LE: loop exit
PB: predicated region body
PF: predicated region fallthrough
CT: control target
= control target key end

     0   :  { %s509_s9 = smov 0   ;;  %s511_s10 = smov 0   ;;  %s564_s0 = inlined_call_operand.vmem [shape: f32[2,2,2,128], index: 0, kind: input, shape index: {}]   ;;  %s565_s1 = inlined_call_operand.vmem [shape: s32[2,2,128], index: 1, kind: input, shape index: {}]   ;;  %s566_s2 = inlined_call_operand.vmem [shape: f32[2,1,4,8,128], index: 2, kind: output, shape index: {}]  }
   0x1   :  { %s513_s11 = smov 0  }
   0x2 LB: > { %s31_s12 = sadd.s32 1, %s487_s10  ;;  %p420_p0 = scmp.ge.s32.totalorder %s491_s11, 1  ;;  %s491_s11 = sphi %s513_s11, %s12_s11   ;;  %s487_s10 = sphi %s511_s10, %s568_s10   ;;  %s483_s9 = sphi %s509_s9, %s567_s9  }
   0x3   : > { %p33_p1 = scmp.ge.s32.totalorder %s31_s12, 2  ;;  %p160_p2 = scmp.lt.s32.totalorder %s491_s11, 3 }
   0x5   : > { %s570_s12 = smov (%p33_p1, %s31_s12), 0  ;;  %p161_p3 = pnand %p420_p0, %p160_p2 }
   0x6   : > { %p199_p4 = scmp.lt.s32.totalorder (!%p161_p3), %s483_s9, 1 }
   0x7   : > { %164 = sbr.rel (%p161_p3) target bundleno = 76 (0x4c), region = 28 }
   0xc   : > { %s572_s9 = smov (!%p199_p4, %s483_s9), 1  ;;  %vm258_vm0 = vcmask 1041408   ;;  %v493_v5 = vmov 0.0   ;;  %v266_v10 = vlaneseq }
   0xd   : > { %s436_s13 = sshll.u32 %s572_s9, 2  ;;  %s423_s14 = sshll.u32 %s572_s9, 1 }
   0xe   : > { %s206_s17 = scalar_lea.vmem %s564_s0, %s436_s13  ;;  %s215_s20 = scalar_lea.vmem %s565_s1, %s423_s14  ;;  %v267_v14 = vshrl.u32 %v266_v10, 7 }
   0xf   : > { %v234_v0 = vld [vmem:[%s206_s17] sm:$0x3]  ;;  %v426_v1 = vld [vmem:[%s206_s17 + $0x2] sm:$0x3]  ;;  %s437_s21 = sshll.u32 %s572_s9, 5 }
  0x10   : > { %v237_v2 = vld [vmem:[%s215_s20] sm:$0x3]  ;;  %v238_v3 = vsub.f32 %v426_v1, %v234_v0  ;;  %vm268_vm2 = vcmp.eq.s32.totalorder %v267_v14, 0  ;;  %s542_s24 = scalar_lea.vmem %s566_s2, %s437_s21 }
  0x11   : > { %vm252_vm1 = vcmp.eq.s32.totalorder %v237_v2, 1 }
  0x12   : > { %v239_v4 = vand.u32 2147483647, %v238_v3  ;;  %v427_v6 = vsel %vm252_vm1, 1.0, %v493_v5  ;;  %vm245_vm3 = vcmp.ge.f32.partialorder %v238_v3, 0.0  ;;  %v248_v22 = vmax.f32 %v238_v3, 0.0 }
  0x13   : > { %v274_v7 = vsel %vm258_vm0, %v427_v6, 0.0  ;;  %v255_v25 = vmul.f32 %v427_v6, %v238_v3 }
  0x14   : > { %v240_v8 = vsub.f32 0.0, %v239_v4  ;;  %v275_v9 = vrot.slane %v274_v7, 4 }
  0x16   : > { %v241_v11 = vmul.f32 1.442695, %v240_v8  ;;  %v276_v12 = vadd.f32 %v275_v9, %v274_v7 }
  0x18   : > { %463 = vpow2.f32 %v241_v11  ;;  %v277_v13 = vrot.slane %v276_v12, 2 }
  0x1a   : > { %v278_v15 = vadd.f32 %v277_v13, %v276_v12 }
  0x1c   : > { %v279_v16 = vrot.slane %v278_v15, 1 }
  0x1e   : > { %v280_v17 = vadd.f32 %v279_v16, %v278_v15 }
  0x20   : > { %v281_v18 = vsel %vm268_vm2, %v280_v17, 0.0 }
  0x21   : > { %429 = vst [vmem:[%s542_s24 + $0x8] sm:$0xff] %v281_v18 }
  0x25   : > { %v464_v19 = vpop.eup %463 }
  0x26   : > { %v243_v20 = vadd.f32 1.0, %v464_v19 }
  0x28   : > { %465 = vrcp.f32 %v243_v20 }
  0x29   : > { %467 = vlog2.f32 %v243_v20 }
  0x35   : > { %v466_v21 = vpop.eup %465 }
  0x36   : > { %v468_v23 = vpop.eup %467  ;;  %v246_v24 = vmul.f32 %v466_v21, %v464_v19 }
  0x37   : > { %v250_v26 = vmul.f32 0.6931472, %v468_v23 }
  0x38   : > { %v247_v27 = vsel %vm245_vm3, %v466_v21, %v246_v24 }
  0x39   : > { %v259_v28 = vsel %vm258_vm0, %v247_v27, 0.0  ;;  %v286_v29 = vmul.f32 %v427_v6, %v247_v27  ;;  %v251_v30 = vadd.f32 %v250_v26, %v248_v22 }
  0x3a   : > { %v260_v31 = vrot.slane %v259_v28, 4 }
  0x3b   : > { %v287_v32 = vsel %vm258_vm0, %v286_v29, 0.0  ;;  %v256_v33 = vsub.f32 %v251_v30, %v255_v25 }
  0x3c   : > { %v261_v34 = vadd.f32 %v260_v31, %v259_v28  ;;  %v288_v35 = vrot.slane %v287_v32, 4 }
  0x3d   : > { %v299_v36 = vsel %vm258_vm0, %v256_v33, 0.0 }
  0x3e   : > { %v262_v37 = vrot.slane %v261_v34, 2  ;;  %v289_v38 = vadd.f32 %v288_v35, %v287_v32  ;;  %v300_v39 = vrot.slane %v299_v36, 4 }
  0x40   : > { %v263_v40 = vadd.f32 %v262_v37, %v261_v34  ;;  %v290_v41 = vrot.slane %v289_v38, 2  ;;  %v301_v42 = vadd.f32 %v300_v39, %v299_v36 }
  0x42   : > { %v264_v43 = vrot.slane %v263_v40, 1  ;;  %v291_v44 = vadd.f32 %v290_v41, %v289_v38  ;;  %v302_v45 = vrot.slane %v301_v42, 2 }
  0x44   : > { %v265_v46 = vadd.f32 %v264_v43, %v263_v40  ;;  %v292_v47 = vrot.slane %v291_v44, 1  ;;  %v303_v48 = vadd.f32 %v302_v45, %v301_v42 }
  0x46   : > { %v269_v49 = vsel %vm268_vm2, %v265_v46, 0.0  ;;  %v293_v50 = vadd.f32 %v292_v47, %v291_v44  ;;  %v304_v51 = vrot.slane %v303_v48, 1 }
  0x47   : > { %271 = vst [vmem:[%s542_s24] sm:$0xff] %v269_v49 }
  0x48   : > { %v294_v52 = vsel %vm268_vm2, %v293_v50, 0.0  ;;  %v305_v53 = vadd.f32 %v304_v51, %v303_v48 }
  0x49   : > { %431 = vst [vmem:[%s542_s24 + $0x10] sm:$0xff] %v294_v52 }
  0x4a   : > { %v306_v54 = vsel %vm268_vm2, %v305_v53, 0.0 }
  0x4b   : > { %433 = vst [vmem:[%s542_s24 + $0x18] sm:$0xff] %v306_v54 }
  0x4c PF: > { %s12_s11 = sadd.s32 1, %s491_s11   ;;  %s567_s9 = smov %s487_s10 }
  0x4d   : > { %p9_p5 = scmp.ge.s32.totalorder %s12_s11, 4   ;;  %s568_s10 = smov %s570_s12 }
  0x4f   :  { %11 = sbr.rel (!%p9_p5) target bundleno = 2 (0x2), region = 69 }

</bundles_post_ra>
